<compile_context>
chip_gen: v7x
topology: tpu7x:2x2x1
jax: 0.10.0
libtpu: 0.0.40
codegen_flags: <defaults>
</compile_context>

<pallas_src>
import numpy as np
import jax
import jax.numpy as jnp
from jax.experimental import pallas as pl
from jax.experimental.pallas import tpu as pltpu

_TWO_PI = 2.0 * np.pi
_LN_EPS = 1e-5          # PyTorch LayerNorm default eps
_LANE = 128
_SUBLANE = 8


def _round_up(x, m):
    return (x + m - 1) // m * m


def _network11_kernel(x_ref, wg_ref, bg_ref, o_ref):
    # ---- LayerNorm statistics: two-pass (numerically safe), f32 on VPU ----
    x = x_ref[...]                                        # (TILE_B, d_in) f32
    inv_d = 1.0 / x.shape[-1]
    mean = jnp.sum(x, axis=-1, keepdims=True) * inv_d
    d = x - mean
    var = jnp.maximum(jnp.sum(d * d, axis=-1, keepdims=True) * inv_d, 0.0)
    xhat = d * jax.lax.rsqrt(var + _LN_EPS)               # (TILE_B, d_in)

    # ---- fused (LN-affine + Linear1 + identity-LeakyReLU + Linear3) matmul ----
    y = jnp.dot(xhat, wg_ref[...],
                preferred_element_type=jnp.float32) + bg_ref[...]   # (TILE_B, d_out)

    # ---- sigmoid * 2*pi (EUP), store straight into the unpadded output block ----
    o_ref[...] = jax.nn.sigmoid(y) * _TWO_PI


def _vmem_limit_cap():
    """Generation-aware scoped-VMEM cap: <=32 MiB on v7x (64 MiB/TC), <=48 MiB else."""
    cap_phys = 64 << 20                     # conservative fallback (v7x per-TC VMEM)
    try:
        info = pltpu.get_tpu_info()
        cap_phys = int(getattr(info, "vmem_capacity_bytes", cap_phys) or cap_phys)
    except Exception:
        pass
    return min(cap_phys // 2, 48 << 20)


def network_11_forward(x, params, *, max_tile_b=4096):
    """x: (B, input_size) float32. params: dict produced by init_params()."""
    B, d_in = x.shape
    d_out = params["w2"].shape[1]

    # ---- fold LN affine + Linear1 + Linear3 into one weight/bias (f32, wrapper) ----
    w1 = params["w1"].astype(jnp.float32)
    w2 = params["w2"].astype(jnp.float32)
    b1 = params["b1"].astype(jnp.float32)
    b2 = params["b2"].astype(jnp.float32)
    gamma = params["gamma"].astype(jnp.float32)           # (1, d_in)
    beta = params["beta"].astype(jnp.float32)             # (1, d_in)

    wf = w1 @ w2                                          # (d_in, d_out)
    bf = b1 @ w2 + b2                                     # (1, d_out)
    wg = gamma.reshape(d_in, 1) * wf                      # (d_in, d_out)
    bg = beta @ wf + bf                                   # (1, d_out)

    # ---- tile selection: lane/sublane-padding-aware VMEM accounting ----
    def lane_pad(c):
        return _round_up(max(int(c), 1), _LANE)

    b8 = _round_up(B, _SUBLANE)
    in_row = lane_pad(d_in) * 4                           # x tile row bytes in VMEM
    out_row = lane_pad(d_out) * 4                         # out tile row bytes in VMEM
    tmp_row = (lane_pad(d_in) + lane_pad(d_out)) * 4      # xhat + y f32 temporaries
    per_row = 2 * in_row + 2 * out_row + tmp_row          # double-buffered I/O + temps
    act_budget = 24 << 20                                 # activation budget (fits v7x easily)

    tile_b = min(max_tile_b, b8, max(_SUBLANE, act_budget // per_row))
    tile_b = max(_SUBLANE, (tile_b // _SUBLANE) * _SUBLANE)
    # Keep >=2 grid steps whenever the batch allows, so ("parallel",) can shard the
    # grid across v7x's 2 TensorCores (harmless on 1-TC v5e/v6e).
    if b8 >= 2 * _SUBLANE:
        tile_b = min(tile_b, _round_up(pl.cdiv(b8, 2), _SUBLANE))

    b_pad = _round_up(b8, tile_b)
    grid_b = b_pad // tile_b

    x_p = jnp.pad(x.astype(jnp.float32), ((0, b_pad - B), (0, 0)))

    # ---- explicit VMEM budget (layout-padded), capped per TPU generation ----
    vmem_bytes = (
        2 * tile_b * in_row                               # x tiles (double-buffered)
        + 2 * tile_b * out_row                            # out tiles (double-buffered)
        + tile_b * tmp_row                                # f32 kernel temporaries
        + 2 * _round_up(d_in, _SUBLANE) * lane_pad(d_out) * 4   # Wg (resident, padded)
        + 2 * _SUBLANE * lane_pad(d_out) * 4              # bg (resident, padded)
    )
    vmem_limit = int(min(max(2 * vmem_bytes + (2 << 20), 8 << 20), _vmem_limit_cap()))

    out = pl.pallas_call(
        _network11_kernel,
        out_shape=jax.ShapeDtypeStruct((b_pad, d_out), jnp.float32),
        grid=(grid_b,),
        in_specs=[
            pl.BlockSpec((tile_b, d_in), lambda i: (i, 0)),   # x: tiled over batch
            pl.BlockSpec((d_in, d_out), lambda i: (0, 0)),    # fused weight (resident)
            pl.BlockSpec((1, d_out), lambda i: (0, 0)),       # fused bias   (resident)
        ],
        # Unpadded output block: last dim equals the full array dim, so writeback is
        # only d_out*4 bytes/row (8x fewer HBM bytes than 128-lane padding).
        out_specs=pl.BlockSpec((tile_b, d_out), lambda i: (i, 0)),
        compiler_params=pltpu.CompilerParams(
            dimension_semantics=("parallel",),
            vmem_limit_bytes=vmem_limit,
        ),
    )(x_p, wg, bg)

    return out[:B, :d_out]


def init_params(key, input_size, n, output_size):
    """Deterministic synthetic init (PyTorch-Linear-style uniform bounds)."""
    k1, k2, k3, k4 = jax.random.split(key, 4)
    bound1 = 1.0 / np.sqrt(input_size)
    bound2 = 1.0 / np.sqrt(n)
    return {
        # LayerNorm: gamma=1, beta=0 (PyTorch default)
        "gamma": jnp.ones((1, input_size), jnp.float32),
        "beta": jnp.zeros((1, input_size), jnp.float32),
        # Linear 1: weights pre-transposed to (in_features, out_features)
        "w1": jax.random.uniform(k1, (input_size, n), jnp.float32, -bound1, bound1),
        "b1": jax.random.uniform(k2, (1, n), jnp.float32, -bound1, bound1),
        # Linear 3: pre-transposed
        "w2": jax.random.uniform(k3, (n, output_size), jnp.float32, -bound2, bound2),
        "b2": jax.random.uniform(k4, (1, output_size), jnp.float32, -bound2, bound2),
    }


def _reference(x, p):
    """Pure-JAX f32 reference with the original (unfused) module semantics."""
    x = x.astype(jnp.float32)
    mean = jnp.mean(x, axis=-1, keepdims=True)
    var = jnp.mean((x - mean) ** 2, axis=-1, keepdims=True)
    xn = (x - mean) / jnp.sqrt(var + _LN_EPS) * p["gamma"] + p["beta"]
    h = xn @ p["w1"] + p["b1"]          # LeakyReLU(negative_slope=1) == identity
    y = h @ p["w2"] + p["b2"]
    return jax.nn.sigmoid(y) * _TWO_PI


if __name__ == "__main__":
    key = jax.random.PRNGKey(0)
    kx, kp = jax.random.split(key)

    B, input_size, n, output_size = 8, 32, 64, 16
    x = jax.random.normal(kx, (B, input_size), jnp.float32)
    params = init_params(kp, input_size, n, output_size)

    out = network_11_forward(x, params)
    out = jax.block_until_ready(out)

    ref = _reference(x, params)
    np.testing.assert_allclose(np.asarray(out), np.asarray(ref),
                               rtol=2e-3, atol=2e-3)
    print("KERNEL_OK")
</pallas_src>

<mosaic_0001>
module attributes {stable_mosaic.version = 11 : i64} {
  func.func @_network11_kernel(%arg0: i32, %arg1: memref<8x32xf32, #tpu.memory_space<vmem>>, %arg2: memref<32x16xf32, #tpu.memory_space<vmem>>, %arg3: memref<1x16xf32, #tpu.memory_space<vmem>>, %arg4: memref<8x16xf32, #tpu.memory_space<vmem>>) attributes {dimension_semantics = [#tpu.dimension_semantics<parallel>], iteration_bounds = array<i64: 1>, scalar_prefetch = 0 : i64, scratch_operands = 0 : i64, tpu.core_type = #tpu.core_type<tc>, window_params = [{transform_indices = @transform_0, window_bounds = array<i64: 8, 32>}, {pipeline_mode = #tpu.pipeline_mode<synchronous>, transform_indices = @transform_1, window_bounds = array<i64: 32, 16>}, {pipeline_mode = #tpu.pipeline_mode<synchronous>, transform_indices = @transform_2, window_bounds = array<i64: 1, 16>}, {transform_indices = @transform_3, window_bounds = array<i64: 8, 16>}]} {
    %c0 = arith.constant 0 : index
    %c0_0 = arith.constant 0 : index
    %0 = vector.load %arg1[%c0, %c0_0] : memref<8x32xf32, #tpu.memory_space<vmem>>, vector<8x32xf32>
    %cst = arith.constant dense<0.000000e+00> : vector<8xf32>
    %1 = vector.multi_reduction <add>, %0, %cst [1] : vector<8x32xf32> to vector<8xf32>
    %2 = vector.shape_cast %1 : vector<8xf32> to vector<8x1xf32>
    %cst_1 = arith.constant 3.125000e-02 : f32
    %3 = vector.broadcast %cst_1 : f32 to vector<8x1xf32>
    %4 = arith.mulf %2, %3 : vector<8x1xf32>
    %5 = vector.broadcast %4 : vector<8x1xf32> to vector<8x32xf32>
    %6 = arith.subf %0, %5 : vector<8x32xf32>
    %7 = arith.mulf %6, %6 : vector<8x32xf32>
    %cst_2 = arith.constant dense<0.000000e+00> : vector<8xf32>
    %8 = vector.multi_reduction <add>, %7, %cst_2 [1] : vector<8x32xf32> to vector<8xf32>
    %9 = vector.shape_cast %8 : vector<8xf32> to vector<8x1xf32>
    %cst_3 = arith.constant 3.125000e-02 : f32
    %10 = vector.broadcast %cst_3 : f32 to vector<8x1xf32>
    %11 = arith.mulf %9, %10 : vector<8x1xf32>
    %cst_4 = arith.constant 0.000000e+00 : f32
    %12 = vector.broadcast %cst_4 : f32 to vector<8x1xf32>
    %13 = arith.maximumf %11, %12 : vector<8x1xf32>
    %cst_5 = arith.constant 9.99999974E-6 : f32
    %14 = vector.broadcast %cst_5 : f32 to vector<8x1xf32>
    %15 = arith.addf %13, %14 : vector<8x1xf32>
    %16 = math.rsqrt %15 : vector<8x1xf32>
    %17 = vector.broadcast %16 : vector<8x1xf32> to vector<8x32xf32>
    %18 = arith.mulf %6, %17 : vector<8x32xf32>
    %c0_6 = arith.constant 0 : index
    %c0_7 = arith.constant 0 : index
    %19 = vector.load %arg2[%c0_6, %c0_7] : memref<32x16xf32, #tpu.memory_space<vmem>>, vector<32x16xf32>
    %cst_8 = arith.constant dense<0.000000e+00> : vector<8x16xf32>
    %20 = tpu.matmul %18, %19, %cst_8 {dimension_numbers = #tpu.dot_dimension_numbers<[1], [0], [0], [1], [0, 0, 1, 1], [], []>} : vector<8x32xf32>, vector<32x16xf32>, vector<8x16xf32> -> vector<8x16xf32>
    %c0_9 = arith.constant 0 : index
    %c0_10 = arith.constant 0 : index
    %21 = vector.load %arg3[%c0_9, %c0_10] : memref<1x16xf32, #tpu.memory_space<vmem>>, vector<1x16xf32>
    %22 = vector.broadcast %21 : vector<1x16xf32> to vector<8x16xf32>
    %23 = arith.addf %20, %22 : vector<8x16xf32>
    %24 = arith.negf %23 : vector<8x16xf32>
    %25 = math.exp %24 : vector<8x16xf32>
    %cst_11 = arith.constant 1.000000e+00 : f32
    %26 = vector.broadcast %cst_11 : f32 to vector<8x16xf32>
    %27 = arith.addf %26, %25 : vector<8x16xf32>
    %28 = arith.divf %26, %27 : vector<8x16xf32>
    %cst_12 = arith.constant 6.28318548 : f32
    %29 = vector.broadcast %cst_12 : f32 to vector<8x16xf32>
    %30 = arith.mulf %28, %29 : vector<8x16xf32>
    %c0_13 = arith.constant 0 : index
    %c0_14 = arith.constant 0 : index
    %31 = vector.load %arg4[%c0_13, %c0_14] : memref<8x16xf32, #tpu.memory_space<vmem>>, vector<8x16xf32>
    tpu.vector_store %arg4[%c0_13, %c0_14], %30 {strides = array<i32>} : memref<8x16xf32, #tpu.memory_space<vmem>>, vector<8x16xf32>,
    return
  }
  func.func @transform_0(%arg0: i32) -> (i32, i32) {
    %c0_i32 = arith.constant 0 : i32
    %c0_i32_0 = arith.constant 0 : i32
    return %arg0, %c0_i32 : i32, i32
  }
  func.func @transform_1(%arg0: i32) -> (i32, i32) {
    %c0_i32 = arith.constant 0 : i32
    %c0_i32_0 = arith.constant 0 : i32
    %c0_i32_1 = arith.constant 0 : i32
    return %c0_i32, %c0_i32_0 : i32, i32
  }
  func.func @transform_2(%arg0: i32) -> (i32, i32) {
    %c0_i32 = arith.constant 0 : i32
    %c0_i32_0 = arith.constant 0 : i32
    %c0_i32_1 = arith.constant 0 : i32
    return %c0_i32, %c0_i32_0 : i32, i32
  }
  func.func @transform_3(%arg0: i32) -> (i32, i32) {
    %c0_i32 = arith.constant 0 : i32
    %c0_i32_0 = arith.constant 0 : i32
    return %arg0, %c0_i32 : i32, i32
  }
}

</mosaic_0001>

<bundles_post_ra>
// kernel: tpu_custom_call.1
= control target key start
LH: loop header
LB: loop body
LE: loop exit
PB: predicated region body
PF: predicated region fallthrough
CT: control target
= control target key end

     0   :  { %vm16_vm0 = vcmask 261120   ;;  %s254_s0 = inlined_call_operand.vmem [shape: f32[8,32], index: 0, kind: input, shape index: {}]   ;;  %s255_s1 = inlined_call_operand.vmem [shape: f32[32,16], index: 1, kind: input, shape index: {}]   ;;  %s256_s2 = inlined_call_operand.vmem [shape: f32[1,16], index: 2, kind: input, shape index: {}]   ;;  %s257_s3 = inlined_call_operand.hbm [shape: f32[8,16], index: 3, kind: output, shape index: {}]  }
   0x1   :  { %v15_v0 = vld [vmem:[%s254_s0] sm:$0xff] }
   0x2   :  { %8 = vsyncpa [#allocation3], 0  ;;  %v17_v1 = vsel %vm16_vm0, %v15_v0, 0.0  ;;  %v31_v7 = vld [vmem:[%s255_s1] sm:$0xff]  ;;  %v32_v8 = vld [vmem:[%s255_s1 + $0x8] sm:$0xff]  ;;  %v197_v10 = vmov 0.0|0.0  }
   0x3   :  { %18 = vadd.xlane.f32.xlu0 %v17_v1  ;;  %v33_v9 = vld [vmem:[%s255_s1 + $0x10] sm:$0xff]  ;;  %157 = vmatprep.subr.bf16.mxu0 %v197_v10  ;;  %v158_v11 = vpack.c.bf16 %v32_v8, %v31_v7  ;;  %v34_v12 = vld [vmem:[%s255_s1 + $0x18] sm:$0xff]  ;;  %vm198_vm1 = vmmov 0   ;;  %v199_v13 = vmov 0.0   ;;  %v138_v21 = vld [vmem:[%s256_s2] ss:$0 sm:$0xff] }
   0x4   :  { %154 = vmatprep.mubr.msk.f32.mxu0 %vm198_vm1, %v199_v13  ;;  %v161_v14 = vpack.c.bf16 %v34_v12, %v33_v9  ;;  %s200_s1 = smov [#allocation2]   ;;  %vm122_vm2 = vcmask 130048  }
   0x5   :  { %159 = vmatpush3.bf16.msra.mxu0 %v158_v11  ;;  %s130_s23 = sshll.u32 %s200_s1, 4  ;;  %s131_s23 = int_to_ptr.vmem [resolvable:$true] %s130_s23 }
   0x6   :  { %160 = vmatprep.subr.bf16.mxu0 %v197_v10  ;;  %s173_s24 = scalar_lea.vmem %s131_s23, 128  ;;  %p178_p1 = scmp.lt.s32.totalorder %s131_s23, %s131_s23 }
   0x7   :  { %p174_p0 = scmp.ne.s32.totalorder %s131_s23, %s173_s24  ;;  %p179_p2 = scmp.lt.s32.totalorder %s173_s24, %s173_s24 }
   0x9   :  { %162 = vmatpush3.bf16.msra.mxu0 %v161_v14  ;;  %p180_p3 = por %p179_p2, %p178_p1 }
   0xb   :  { %p181_p4 = pnand %p180_p3, %p174_p0 }
  0x90   :  { %v19_v2 = vpop.xlane.xlu0 %18 }
  0x91   :  { %v20_v3 = vmul.f32 0.03125, %v19_v2 }
  0x93   :  { %v21_v4 = vsub.f32 %v15_v0, %v20_v3 }
  0x95   :  { %v22_v5 = vmul.f32 %v21_v4, %v21_v4 }
  0x97   :  { %v23_v6 = vsel %vm16_vm0, %v22_v5, 0.0 }
  0x98   :  { %24 = vadd.xlane.f32.xlu0 %v23_v6 }
 0x125   :  { %v25_v15 = vpop.xlane.xlu0 %24 }
 0x126   :  { %v26_v16 = vmul.f32 0.03125, %v25_v15 }
 0x128   :  { %v27_v17 = vmax.f32 %v26_v16, 0.0 }
 0x12a   :  { %v28_v18 = vadd.f32 1e-05, %v27_v17 }
 0x12c   :  { %167 = vrsqrt.f32 %v28_v18 }
 0x136   :  { %v168_v19 = vpop.eup %167 }
 0x137   :  { %v30_v20 = vmul.f32 %v168_v19, %v21_v4 }
 0x139   :  { %155 = vmatmul.mubr.msk.f32.vlgmr.msra.gmra.mrb[0].mxu0 %vm16_vm0, %v30_v20 }
 0x20c   :  { %v111_v22 = vpop.f32.mrb[0].mxu0 }
 0x20d   :  { %v112_v23 = vadd.f32 %v138_v21, %v111_v22  ;;  %v156_v24 = vpop.f32.mrb[1].mxu0 }
 0x20f   :  { %v140_v25 = vmul.f32 -1.442695, %v112_v23 }
 0x211   :  { %169 = vpow2.f32 %v140_v25 }
 0x21b   :  { %v170_v26 = vpop.eup %169 }
 0x21c   :  { %v118_v27 = vadd.f32 1.0, %v170_v26 }
 0x21e   :  { %171 = vrcp.f32 %v118_v27 }
 0x228   :  { %v172_v28 = vpop.eup %171 }
 0x229   :  { %v121_v29 = vmul.f32 6.2831855, %v172_v28 }
 0x22b   :  { %123 = vst.msk [vmem:[#allocation2] sm:$0xff] %vm122_vm2, %v121_v29 }
 0x22c   :  { %184 = shalt.err (!%p181_p4)
}
 0x22d   :  { %s185_s26 = scalar_lea.hbm %s257_s3, 128 }
 0x22e   :  { %p186_p5 = scmp.ne.s32.totalorder %s257_s3, %s185_s26  ;;  %p189_p6 = scmp.lt.u32.totalorder %s185_s26, %s257_s3 }
 0x230   :  { %p191_p7 = pnand %p189_p6, %p186_p5 }
 0x232   :  { %194 = shalt.err (!%p191_p7)
}
 0x233   :  { %133 = dma.vmem_to_hbm [thread:$0]  %s131_s23, 128, %s257_s3, [#allocation3]  }
 0x234   :  { %195 = dma.done.wait [#allocation3], 128  }
 0x235   :  { %196 = vsyncadd [#allocation3], 4294967168 }
 0x236   :  { %137 = vsyncpa [#allocation3], 1 }

</bundles_post_ra>
